<compile_context>
chip_gen: v5e
topology: v5e:2x2
jax: 0.10.0
libtpu: 0.0.40
codegen_flags: <defaults>
</compile_context>

<pallas_src>
import functools

import jax
import jax.numpy as jnp
from jax.experimental import pallas as pl
from jax.experimental.pallas import tpu as pltpu

HIDDEN = 256
SUBLANE = 8
BF16_SUBLANE = 16
BIG_TILE = 1024


def _round_up(x, m):
    return ((x + m - 1) // m) * m


def _bucket_batch(batch):
    """Bucket batch sizes so we compile once per bucket, not per batch."""
    if batch <= SUBLANE:
        return SUBLANE
    if batch <= BIG_TILE:
        return 1 << (batch - 1).bit_length()          # next power of two
    return _round_up(batch, BIG_TILE)                 # multiples of 1024


def _choose_tile(batch_b):
    """Batch tile: big tiles to amortize per-step overhead, but >= 2 grid
    steps whenever batch_b >= 16 so both v7x TensorCores get work."""
    if batch_b <= SUBLANE:
        return batch_b
    if batch_b <= 2 * BIG_TILE:
        return max(SUBLANE, batch_b // 2)
    return BIG_TILE


# --------------------------------------------------------------------------
# Kernel: full 3-layer MLP hot path (3 MXU matmuls, f32 accumulate, VPU/EUP
# elementwise in f32, lane-exact store).
# --------------------------------------------------------------------------
def actor_mlp_kernel(x_ref, w1_ref, b1_ref, w2_ref, b2_ref, w3_ref, b3_ref,
                     out_ref, *, max_action, k_pad):
    # Raw f32 state tile; cast to the weight (compute) dtype in VMEM.
    x = x_ref[...].astype(w1_ref.dtype)                     # (tile_b, state_dim)
    if k_pad:  # static: only when state_dim is not a multiple of 16
        x = jnp.concatenate(
            [x, jnp.zeros((x.shape[0], k_pad), x.dtype)], axis=1)

    # Layer 1: Linear(state_dim_p, 256) + ReLU (f32 accumulate).
    h = jnp.dot(x, w1_ref[...], preferred_element_type=jnp.float32) + b1_ref[...]
    h = jnp.maximum(h, 0.0)

    # Layer 2: Linear(256, 256) + ReLU.
    h = jnp.dot(h.astype(w2_ref.dtype), w2_ref[...],
                preferred_element_type=jnp.float32) + b2_ref[...]
    h = jnp.maximum(h, 0.0)

    # Layer 3: Linear(256, out_p) + Tanh, scaled by max_action.
    # Dummy columns have zero weight/bias -> exactly 0 output.
    h = jnp.dot(h.astype(w3_ref.dtype), w3_ref[...],
                preferred_element_type=jnp.float32) + b3_ref[...]
    out_ref[...] = (max_action * jnp.tanh(h)).astype(out_ref.dtype)


# --------------------------------------------------------------------------
# Cached builder: one compiled pallas_call + jit wrapper per bucket signature.
# --------------------------------------------------------------------------
@functools.lru_cache(maxsize=None)
def _build_actor_forward(batch_b, state_dim, state_dim_p, hidden, out_p,
                         max_action, compute_dtype_name):
    itemsize = jnp.dtype(compute_dtype_name).itemsize
    tile_b = _choose_tile(batch_b)
    grid = (pl.cdiv(batch_b, tile_b),)
    k_pad = state_dim_p - state_dim

    kernel = functools.partial(actor_mlp_kernel,
                               max_action=float(max_action), k_pad=k_pad)

    flops = 2 * batch_b * (state_dim_p * hidden + hidden * hidden + hidden * out_p)
    weight_bytes = (state_dim_p * hidden + hidden * hidden + hidden * out_p) * itemsize
    bias_bytes = (2 * hidden + out_p) * 4
    bytes_accessed = (batch_b * state_dim * 4 + weight_bytes + bias_bytes
                      + batch_b * out_p * 4)

    call = pl.pallas_call(
        kernel,
        out_shape=jax.ShapeDtypeStruct((batch_b, out_p), jnp.float32),
        grid_spec=pltpu.PrefetchScalarGridSpec(
            num_scalar_prefetch=0,
            grid=grid,
            in_specs=[
                # x: streamed per batch tile, full-extent (narrow) last dim.
                pl.BlockSpec((tile_b, state_dim), lambda i: (i, 0)),
                # Weights/biases: constant index_map -> fetched once, resident.
                pl.BlockSpec((state_dim_p, hidden), lambda i: (0, 0)),   # w1
                pl.BlockSpec((1, hidden), lambda i: (0, 0)),             # b1
                pl.BlockSpec((hidden, hidden), lambda i: (0, 0)),        # w2
                pl.BlockSpec((1, hidden), lambda i: (0, 0)),             # b2
                pl.BlockSpec((hidden, out_p), lambda i: (0, 0)),         # w3
                pl.BlockSpec((1, out_p), lambda i: (0, 0)),              # b3
            ],
            # Lane-exact output (full-extent last dim -> masked store), no
            # padded slab + follow-up slice pass.
            out_specs=pl.BlockSpec((tile_b, out_p), lambda i: (i, 0)),
        ),
        compiler_params=pltpu.CompilerParams(
            dimension_semantics=("parallel",),
            vmem_limit_bytes=32 * 1024 * 1024,  # safe for v7x scoped VMEM
        ),
        cost_estimate=pl.CostEstimate(
            flops=flops,
            transcendentals=batch_b * out_p,
            bytes_accessed=bytes_accessed,
        ),
    )

    @jax.jit
    def forward(state, w1, b1, w2, b2, w3, b3):
        return call(state, w1, b1, w2, b2, w3, b3)

    return forward


# --------------------------------------------------------------------------
# Parameter helpers.
# --------------------------------------------------------------------------
def init_actor_params(key, state_dim, action_dim, hidden=HIDDEN):
    """PyTorch-default-style init. Weights stored (in_features, out_features)."""
    def linear_init(k, fan_in, fan_out):
        kw, kb = jax.random.split(k)
        bound = 1.0 / jnp.sqrt(fan_in)
        w = jax.random.uniform(kw, (fan_in, fan_out), jnp.float32, -bound, bound)
        b = jax.random.uniform(kb, (1, fan_out), jnp.float32, -bound, bound)
        return w, b

    k1, k2, k3 = jax.random.split(key, 3)
    w1, b1 = linear_init(k1, state_dim, hidden)
    w2, b2 = linear_init(k2, hidden, hidden)
    w3, b3 = linear_init(k3, hidden, action_dim)
    return (w1, b1, w2, b2, w3, b3)


def prepare_actor_params(params, *, n_dummy_dim=0, compute_dtype=jnp.bfloat16):
    """One-time padding/casting of weights for the kernel.

    - w1 rows padded state_dim -> multiple of 16 (bf16 sublane); zero rows
      contribute nothing to the dot.
    - w3/b3 cols padded action_dim -> action_dim + n_dummy_dim with zeros, so
      the dummy columns come out exactly 0 (absorbs the hstack).
    - weights cast to compute_dtype (bf16) for the MXU, biases kept f32.
    """
    w1, b1, w2, b2, w3, b3 = params
    state_dim, hidden = w1.shape
    action_dim = w3.shape[1]
    state_dim_p = _round_up(max(state_dim, 1), BF16_SUBLANE)
    out_p = action_dim + n_dummy_dim

    cdt = compute_dtype
    w1p = jnp.pad(w1, ((0, state_dim_p - state_dim), (0, 0))).astype(cdt)
    w2p = w2.astype(cdt)
    w3p = jnp.pad(w3, ((0, 0), (0, out_p - action_dim))).astype(cdt)
    b1p = b1.reshape(1, hidden).astype(jnp.float32)
    b2p = b2.reshape(1, hidden).astype(jnp.float32)
    b3p = jnp.pad(b3.reshape(1, action_dim).astype(jnp.float32),
                  ((0, 0), (0, out_p - action_dim)))

    meta = dict(state_dim=state_dim, state_dim_p=state_dim_p,
                action_dim=action_dim, hidden=hidden, out_p=out_p,
                n_dummy_dim=n_dummy_dim,
                compute_dtype=jnp.dtype(cdt).name)
    return (w1p, b1p, w2p, b2p, w3p, b3p), meta


def actor_forward(state, prepared_params, meta, max_action, n_dummy_dim=None):
    """Mirrors Actor.forward: returns (batch, action_dim + n_dummy_dim)."""
    if n_dummy_dim is None:
        n_dummy_dim = meta["n_dummy_dim"]
    batch = state.shape[0]
    out_width = meta["action_dim"] + n_dummy_dim
    out_p = meta["out_p"]

    batch_b = _bucket_batch(batch)
    fwd = _build_actor_forward(batch_b, meta["state_dim"], meta["state_dim_p"],
                               meta["hidden"], out_p,
                               float(max_action), meta["compute_dtype"])

    x = state
    if batch_b != batch:
        # Row padding only (batch dim, tiny); no K/lane padding anywhere.
        x = jnp.pad(x, ((0, batch_b - batch), (0, 0)))
    w1, b1, w2, b2, w3, b3 = prepared_params
    y = fwd(x, w1, b1, w2, b2, w3, b3)
    if batch_b != batch:
        y = y[:batch]

    if out_width == out_p:
        return y
    if out_width < out_p:
        # Prepared with more dummy columns than requested; extras are exact 0.
        return y[:, :out_width]
    # Requested more dummy columns than prepared for: zero-concat the overflow.
    return jnp.concatenate(
        [y, jnp.zeros((batch, out_width - out_p), y.dtype)], axis=1)


# --------------------------------------------------------------------------
# Self-test.
# --------------------------------------------------------------------------
if __name__ == "__main__":
    batch = 8
    state_dim = 16
    action_dim = 4
    max_action = 2.0
    n_dummy_dim = 3

    key = jax.random.PRNGKey(0)
    pkey, skey, skey2 = jax.random.split(key, 3)
    params = init_actor_params(pkey, state_dim, action_dim)
    state = jax.random.normal(skey, (batch, state_dim), dtype=jnp.float32)

    prepared, meta = prepare_actor_params(params, n_dummy_dim=n_dummy_dim)

    # No dummy dims.
    action = actor_forward(state, prepared, meta, max_action, n_dummy_dim=0)
    action = jax.block_until_ready(action)
    assert action.shape == (batch, action_dim)
    assert bool(jnp.all(jnp.abs(action) <= max_action + 1e-4))

    # With dummy dims: absorbed by zero weight/bias columns, exact zeros.
    action_d = actor_forward(state, prepared, meta, max_action,
                             n_dummy_dim=n_dummy_dim)
    action_d = jax.block_until_ready(action_d)
    assert action_d.shape == (batch, action_dim + n_dummy_dim)
    assert bool(jnp.all(action_d[:, action_dim:] == 0.0))
    assert bool(jnp.allclose(action_d[:, :action_dim], action))

    # Tight check: identical bf16 path in plain JAX.
    def ref_same_path(x, prep, ma, width):
        w1, b1, w2, b2, w3, b3 = prep
        sp = w1.shape[0]
        xp = jnp.pad(x, ((0, 0), (0, sp - x.shape[1]))).astype(w1.dtype)
        h = jnp.maximum(jnp.dot(xp, w1, preferred_element_type=jnp.float32) + b1, 0.0)
        h = jnp.maximum(jnp.dot(h.astype(w2.dtype), w2,
                                preferred_element_type=jnp.float32) + b2, 0.0)
        y = ma * jnp.tanh(jnp.dot(h.astype(w3.dtype), w3,
                                  preferred_element_type=jnp.float32) + b3)
        return y[:, :width]

    ref_tight = ref_same_path(state, prepared, max_action, action_dim)
    assert bool(jnp.allclose(action, ref_tight, atol=1e-3, rtol=1e-3))

    # Loose check vs. the original f32 math (bf16 weight-rounding tolerance).
    def ref_f32(x, p, ma):
        w1, b1, w2, b2, w3, b3 = p
        h = jnp.maximum(x @ w1 + b1, 0.0)
        h = jnp.maximum(h @ w2 + b2, 0.0)
        return ma * jnp.tanh(h @ w3 + b3)

    ref_loose = ref_f32(state, params, max_action)
    assert bool(jnp.allclose(action, ref_loose, atol=1e-1, rtol=1e-1))

    # Larger, non-bucket batch: exercises bucketing (50 -> 64), row pad/slice
    # and a 2-step parallel grid.
    batch2 = 50
    state2 = jax.random.normal(skey2, (batch2, state_dim), dtype=jnp.float32)
    action2 = actor_forward(state2, prepared, meta, max_action,
                            n_dummy_dim=n_dummy_dim)
    action2 = jax.block_until_ready(action2)
    assert action2.shape == (batch2, action_dim + n_dummy_dim)
    assert bool(jnp.all(action2[:, action_dim:] == 0.0))
    ref2 = ref_f32(state2, params, max_action)
    assert bool(jnp.allclose(action2[:, :action_dim], ref2, atol=1e-1, rtol=1e-1))

    print("KERNEL_OK")
</pallas_src>

<mosaic_0001>
module attributes {stable_mosaic.version = 11 : i64} {
  func.func @actor_mlp_kernel(%arg0: i32, %arg1: memref<8x16xf32, #tpu.memory_space<vmem>>, %arg2: memref<16x256xbf16, #tpu.memory_space<vmem>>, %arg3: memref<1x256xf32, #tpu.memory_space<vmem>>, %arg4: memref<256x256xbf16, #tpu.memory_space<vmem>>, %arg5: memref<1x256xf32, #tpu.memory_space<vmem>>, %arg6: memref<256x7xbf16, #tpu.memory_space<vmem>>, %arg7: memref<1x7xf32, #tpu.memory_space<vmem>>, %arg8: memref<8x7xf32, #tpu.memory_space<vmem>>) attributes {dimension_semantics = [#tpu.dimension_semantics<parallel>], iteration_bounds = array<i64: 1>, scalar_prefetch = 0 : i64, scratch_operands = 0 : i64, tpu.core_type = #tpu.core_type<tc>, window_params = [{transform_indices = @transform_0, window_bounds = array<i64: 8, 16>}, {pipeline_mode = #tpu.pipeline_mode<synchronous>, transform_indices = @transform_1, window_bounds = array<i64: 16, 256>}, {pipeline_mode = #tpu.pipeline_mode<synchronous>, transform_indices = @transform_2, window_bounds = array<i64: 1, 256>}, {pipeline_mode = #tpu.pipeline_mode<synchronous>, transform_indices = @transform_3, window_bounds = array<i64: 256, 256>}, {pipeline_mode = #tpu.pipeline_mode<synchronous>, transform_indices = @transform_4, window_bounds = array<i64: 1, 256>}, {pipeline_mode = #tpu.pipeline_mode<synchronous>, transform_indices = @transform_5, window_bounds = array<i64: 256, 7>}, {pipeline_mode = #tpu.pipeline_mode<synchronous>, transform_indices = @transform_6, window_bounds = array<i64: 1, 7>}, {transform_indices = @transform_7, window_bounds = array<i64: 8, 7>}]} {
    %c0 = arith.constant 0 : index
    %c0_0 = arith.constant 0 : index
    %0 = vector.load %arg1[%c0, %c0_0] : memref<8x16xf32, #tpu.memory_space<vmem>>, vector<8x16xf32>
    %1 = arith.truncf %0 : vector<8x16xf32> to vector<8x16xbf16>
    %c0_1 = arith.constant 0 : index
    %c0_2 = arith.constant 0 : index
    %2 = vector.load %arg2[%c0_1, %c0_2] : memref<16x256xbf16, #tpu.memory_space<vmem>>, vector<16x256xbf16>
    %cst = arith.constant dense<0.000000e+00> : vector<8x256xf32>
    %3 = tpu.matmul %1, %2, %cst {dimension_numbers = #tpu.dot_dimension_numbers<[1], [0], [0], [1], [0, 0, 1, 1], [], []>} : vector<8x16xbf16>, vector<16x256xbf16>, vector<8x256xf32> -> vector<8x256xf32>
    %c0_3 = arith.constant 0 : index
    %c0_4 = arith.constant 0 : index
    %4 = vector.load %arg3[%c0_3, %c0_4] : memref<1x256xf32, #tpu.memory_space<vmem>>, vector<1x256xf32>
    %5 = vector.broadcast %4 : vector<1x256xf32> to vector<8x256xf32>
    %6 = arith.addf %3, %5 : vector<8x256xf32>
    %cst_5 = arith.constant 0.000000e+00 : f32
    %7 = vector.broadcast %cst_5 : f32 to vector<8x256xf32>
    %8 = arith.maximumf %6, %7 : vector<8x256xf32>
    %9 = arith.truncf %8 : vector<8x256xf32> to vector<8x256xbf16>
    %c0_6 = arith.constant 0 : index
    %c0_7 = arith.constant 0 : index
    %10 = vector.load %arg4[%c0_6, %c0_7] : memref<256x256xbf16, #tpu.memory_space<vmem>>, vector<256x256xbf16>
    %cst_8 = arith.constant dense<0.000000e+00> : vector<8x256xf32>
    %11 = tpu.matmul %9, %10, %cst_8 {dimension_numbers = #tpu.dot_dimension_numbers<[1], [0], [0], [1], [0, 0, 1, 1], [], []>} : vector<8x256xbf16>, vector<256x256xbf16>, vector<8x256xf32> -> vector<8x256xf32>
    %c0_9 = arith.constant 0 : index
    %c0_10 = arith.constant 0 : index
    %12 = vector.load %arg5[%c0_9, %c0_10] : memref<1x256xf32, #tpu.memory_space<vmem>>, vector<1x256xf32>
    %13 = vector.broadcast %12 : vector<1x256xf32> to vector<8x256xf32>
    %14 = arith.addf %11, %13 : vector<8x256xf32>
    %cst_11 = arith.constant 0.000000e+00 : f32
    %15 = vector.broadcast %cst_11 : f32 to vector<8x256xf32>
    %16 = arith.maximumf %14, %15 : vector<8x256xf32>
    %17 = arith.truncf %16 : vector<8x256xf32> to vector<8x256xbf16>
    %c0_12 = arith.constant 0 : index
    %c0_13 = arith.constant 0 : index
    %18 = vector.load %arg6[%c0_12, %c0_13] : memref<256x7xbf16, #tpu.memory_space<vmem>>, vector<256x7xbf16>
    %cst_14 = arith.constant dense<0.000000e+00> : vector<8x7xf32>
    %19 = tpu.matmul %17, %18, %cst_14 {dimension_numbers = #tpu.dot_dimension_numbers<[1], [0], [0], [1], [0, 0, 1, 1], [], []>} : vector<8x256xbf16>, vector<256x7xbf16>, vector<8x7xf32> -> vector<8x7xf32>
    %c0_15 = arith.constant 0 : index
    %c0_16 = arith.constant 0 : index
    %20 = vector.load %arg7[%c0_15, %c0_16] : memref<1x7xf32, #tpu.memory_space<vmem>>, vector<1x7xf32>
    %21 = vector.broadcast %20 : vector<1x7xf32> to vector<8x7xf32>
    %22 = arith.addf %19, %21 : vector<8x7xf32>
    %23 = math.tanh %22 : vector<8x7xf32>
    %cst_17 = arith.constant 2.000000e+00 : f32
    %24 = vector.broadcast %cst_17 : f32 to vector<8x7xf32>
    %25 = arith.mulf %24, %23 : vector<8x7xf32>
    %c0_18 = arith.constant 0 : index
    %c0_19 = arith.constant 0 : index
    %26 = vector.load %arg8[%c0_18, %c0_19] : memref<8x7xf32, #tpu.memory_space<vmem>>, vector<8x7xf32>
    tpu.vector_store %arg8[%c0_18, %c0_19], %25 {strides = array<i32>} : memref<8x7xf32, #tpu.memory_space<vmem>>, vector<8x7xf32>,
    return
  }
  func.func @transform_0(%arg0: i32) -> (i32, i32) {
    %c0_i32 = arith.constant 0 : i32
    %c0_i32_0 = arith.constant 0 : i32
    return %arg0, %c0_i32 : i32, i32
  }
  func.func @transform_1(%arg0: i32) -> (i32, i32) {
    %c0_i32 = arith.constant 0 : i32
    %c0_i32_0 = arith.constant 0 : i32
    %c0_i32_1 = arith.constant 0 : i32
    return %c0_i32, %c0_i32_0 : i32, i32
  }
  func.func @transform_2(%arg0: i32) -> (i32, i32) {
    %c0_i32 = arith.constant 0 : i32
    %c0_i32_0 = arith.constant 0 : i32
    %c0_i32_1 = arith.constant 0 : i32
    return %c0_i32, %c0_i32_0 : i32, i32
  }
  func.func @transform_3(%arg0: i32) -> (i32, i32) {
    %c0_i32 = arith.constant 0 : i32
    %c0_i32_0 = arith.constant 0 : i32
    %c0_i32_1 = arith.constant 0 : i32
    return %c0_i32, %c0_i32_0 : i32, i32
  }
  func.func @transform_4(%arg0: i32) -> (i32, i32) {
    %c0_i32 = arith.constant 0 : i32
    %c0_i32_0 = arith.constant 0 : i32
    %c0_i32_1 = arith.constant 0 : i32
    return %c0_i32, %c0_i32_0 : i32, i32
  }
  func.func @transform_5(%arg0: i32) -> (i32, i32) {
    %c0_i32 = arith.constant 0 : i32
    %c0_i32_0 = arith.constant 0 : i32
    %c0_i32_1 = arith.constant 0 : i32
    return %c0_i32, %c0_i32_0 : i32, i32
  }
  func.func @transform_6(%arg0: i32) -> (i32, i32) {
    %c0_i32 = arith.constant 0 : i32
    %c0_i32_0 = arith.constant 0 : i32
    %c0_i32_1 = arith.constant 0 : i32
    return %c0_i32, %c0_i32_0 : i32, i32
  }
  func.func @transform_7(%arg0: i32) -> (i32, i32) {
    %c0_i32 = arith.constant 0 : i32
    %c0_i32_0 = arith.constant 0 : i32
    return %arg0, %c0_i32 : i32, i32
  }
}

</mosaic_0001>

<bundles_post_ra>
// kernel: forward.1
= control target key start
LH: loop header
LB: loop body
LE: loop exit
PB: predicated region body
PF: predicated region fallthrough
CT: control target
= control target key end

     0   :  { %12 = vsyncpa [#allocation3], 0  ;;  %s966_s0 = inlined_call_operand.vmem [shape: f32[8,16], index: 0, kind: input, shape index: {}]   ;;  %s967_s1 = inlined_call_operand.vmem [shape: bf16[16,256], index: 1, kind: input, shape index: {}]   ;;  %s968_s2 = inlined_call_operand.vmem [shape: f32[1,256], index: 2, kind: input, shape index: {}]   ;;  %s969_s3 = inlined_call_operand.hbm [shape: bf16[256,256], index: 3, kind: input, shape index: {}]   ;;  %s970_s4 = inlined_call_operand.vmem [shape: f32[1,256], index: 4, kind: input, shape index: {}]   ;;  %s971_s5 = inlined_call_operand.vmem [shape: bf16[256,7], index: 5, kind: input, shape index: {}]   ;;  %s972_s6 = inlined_call_operand.vmem [shape: f32[1,7], index: 6, kind: input, shape index: {}]   ;;  %s973_s7 = inlined_call_operand.hbm [shape: f32[8,7], index: 7, kind: output, shape index: {}]  }
   0x1   :  { %13 = vsyncpa [#allocation4], 0  ;;  %s24_s26 = sshll.u32 %s969_s3, 4  ;;  %s842_s27 = smov [#allocation2]   ;;  %s25_s26 = int_to_ptr.hbm [resolvable:$true] %s24_s26 }
   0x2   :  { %s26_s28 = sshll.u32 %s842_s27, 4  ;;  %s843_s29 = smov 128   ;;  %s27_s28 = int_to_ptr.vmem [resolvable:$true] %s26_s28 }
   0x3   :  { %s844_s30 = smov 8  }
   0x4   :  { %32 = dma.hbm_to_vmem [thread:$0]  %s25_s26, 4096, %s27_s28, [#allocation3], %s843_s29, %s843_s29, %s844_s30  }
   0x5   :  { %838 = dma.done.wait [#allocation3], 4096  }
   0x6   :  { %839 = vsyncadd [#allocation3], 4294963200  ;;  %v533_v0 = vld [vmem:[%s967_s1] sm:$0xf]  ;;  %v734_v1 = vld [vmem:[%s967_s1 + $0x4] sm:$0xf0] }
   0x7   :  { %v733_v2 = vld [vmem:[%s967_s1 + $0x4] sm:$0xf]  ;;  %v534_v3 = vor.u32 %v734_v1, %v533_v0  ;;  %v535_v4 = vld [vmem:[%s967_s1 + $0x8] sm:$0xf0]  ;;  %vm64_vm0 = vcmask 130048   ;;  %s845_s24 = smov [#allocation5]  }
   0x8   :  { %v44_v5 = vld [vmem:[%s966_s0] sm:$0xff]  ;;  %v599_v6 = vld [vmem:[#allocation2 + $0x70] sm:$0xf]  ;;  %v538_v7 = vor.u32 %v733_v2, %v535_v4  ;;  %v750_v9 = vld [vmem:[#allocation2 + $0x74] sm:$0xf0]  ;;  %s519_s25 = sshll.u32 %s845_s24, 4  ;;  %s520_s25 = int_to_ptr.vmem [resolvable:$true] %s519_s25 }
   0x9   :  { %v45_v8 = vpack.c.bf16 %v44_v5, %v44_v5  ;;  %v663_v10 = vld [vmem:[#allocation2 + $0xf0] sm:$0xf]  ;;  %v766_v11 = vld [vmem:[#allocation2 + $0xf4] sm:$0xf0]  ;;  %75 = vmatpush.bf16.msra.mxu0 %v534_v3  ;;  %v600_v12 = vor.u32 %v750_v9, %v599_v6  ;;  %v749_v14 = vld [vmem:[#allocation2 + $0x74] sm:$0xf] }
   0xa   :  { %v664_v13 = vor.u32 %v766_v11, %v663_v10  ;;  %v601_v15 = vld [vmem:[#allocation2 + $0x78] sm:$0xf0]  ;;  %v765_v16 = vld [vmem:[#allocation2 + $0xf4] sm:$0xf]  ;;  %88 = vmatpush.bf16.msra.mxu1 %v538_v7  ;;  %v591_v19 = vld [vmem:[#allocation2 + $0x60] sm:$0xf] }
   0xb   :  { %v604_v17 = vor.u32 %v749_v14, %v601_v15  ;;  %v665_v18 = vld [vmem:[#allocation2 + $0xf8] sm:$0xf0]  ;;  %v748_v20 = vld [vmem:[#allocation2 + $0x64] sm:$0xf0]  ;;  %296 = vmatpush.bf16.msra.mxu2 %v600_v12  ;;  %v655_v23 = vld [vmem:[#allocation2 + $0xe0] sm:$0xf] }
   0xc   :  { %309 = vmatpush.bf16.msra.mxu3 %v664_v13  ;;  %v668_v21 = vor.u32 %v765_v16, %v665_v18  ;;  %v592_v22 = vor.u32 %v748_v20, %v591_v19  ;;  %v764_v24 = vld [vmem:[#allocation2 + $0xe4] sm:$0xf0]  ;;  %v747_v25 = vld [vmem:[#allocation2 + $0x64] sm:$0xf]  ;;  %539 = vmatmul.msk.bf16.vlgmr.msra.gmra.mxu0 %vm64_vm0, %v45_v8  ;;  %v593_v27 = vld [vmem:[#allocation2 + $0x68] sm:$0xf0] }
   0xd   :  { %v656_v26 = vor.u32 %v764_v24, %v655_v23  ;;  %v763_v28 = vld [vmem:[#allocation2 + $0xe4] sm:$0xf]  ;;  %v657_v29 = vld [vmem:[#allocation2 + $0xe8] sm:$0xf0]  ;;  %540 = vmatmul.msk.bf16.vlgmr.msra.gmra.mxu1 %vm64_vm0, %v45_v8  ;;  %322 = vmatpush.bf16.msrb.mxu0 %v604_v17  ;;  %v596_v30 = vor.u32 %v747_v25, %v593_v27  ;;  %v583_v31 = vld [vmem:[#allocation2 + $0x50] sm:$0xf] }
   0xe   :  { %v746_v32 = vld [vmem:[#allocation2 + $0x54] sm:$0xf0]  ;;  %v647_v33 = vld [vmem:[#allocation2 + $0xd0] sm:$0xf]  ;;  %335 = vmatpush.bf16.msrb.mxu1 %v668_v21  ;;  %v660_v34 = vor.u32 %v763_v28, %v657_v29  ;;  %v745_v36 = vld [vmem:[#allocation2 + $0x54] sm:$0xf] }
   0xf   :  { %v762_v35 = vld [vmem:[#allocation2 + $0xd4] sm:$0xf0]  ;;  %v585_v37 = vld [vmem:[#allocation2 + $0x58] sm:$0xf0]  ;;  %297 = vmatpush.bf16.msra.mxu2 %v592_v22  ;;  %v584_v38 = vor.u32 %v746_v32, %v583_v31  ;;  %v761_v40 = vld [vmem:[#allocation2 + $0xd4] sm:$0xf] }
  0x10   :  { %310 = vmatpush.bf16.msra.mxu3 %v656_v26  ;;  %v648_v39 = vor.u32 %v762_v35, %v647_v33  ;;  %v649_v41 = vld [vmem:[#allocation2 + $0xd8] sm:$0xf0]  ;;  %v575_v42 = vld [vmem:[#allocation2 + $0x40] sm:$0xf]  ;;  %v744_v43 = vld [vmem:[#allocation2 + $0x44] sm:$0xf0]  ;;  %v588_v46 = vor.u32 %v745_v36, %v585_v37 }
  0x11   :  { %v639_v44 = vld [vmem:[#allocation2 + $0xc0] sm:$0xf]  ;;  %v760_v45 = vld [vmem:[#allocation2 + $0xc4] sm:$0xf0]  ;;  %323 = vmatpush.bf16.msrb.mxu0 %v596_v30  ;;  %v652_v47 = vor.u32 %v761_v40, %v649_v41  ;;  %v743_v48 = vld [vmem:[#allocation2 + $0x44] sm:$0xf]  ;;  %v576_v50 = vor.u32 %v744_v43, %v575_v42 }
  0x12   :  { %336 = vmatpush.bf16.msrb.mxu1 %v660_v34  ;;  %v577_v49 = vld [vmem:[#allocation2 + $0x48] sm:$0xf0]  ;;  %v640_v51 = vor.u32 %v760_v45, %v639_v44  ;;  %v759_v52 = vld [vmem:[#allocation2 + $0xc4] sm:$0xf]  ;;  %v567_v54 = vld [vmem:[#allocation2 + $0x30] sm:$0xf] }
  0x13   :  { %298 = vmatpush.bf16.msra.mxu2 %v584_v38  ;;  %v641_v53 = vld [vmem:[#allocation2 + $0xc8] sm:$0xf0]  ;;  %v742_v55 = vld [vmem:[#allocation2 + $0x34] sm:$0xf0]  ;;  %v631_v56 = vld [vmem:[#allocation2 + $0xb0] sm:$0xf]  ;;  %v580_v58 = vor.u32 %v743_v48, %v577_v49 }
  0x14   :  { %311 = vmatpush.bf16.msra.mxu3 %v648_v39  ;;  %v758_v57 = vld [vmem:[#allocation2 + $0xb4] sm:$0xf0]  ;;  %v644_v59 = vor.u32 %v759_v52, %v641_v53  ;;  %v741_v60 = vld [vmem:[#allocation2 + $0x34] sm:$0xf]  ;;  %v569_v61 = vld [vmem:[#allocation2 + $0x38] sm:$0xf0]  ;;  %v568_v63 = vor.u32 %v742_v55, %v567_v54 }
  0x15   :  { %324 = vmatpush.bf16.msrb.mxu0 %v588_v46  ;;  %v757_v62 = vld [vmem:[#allocation2 + $0xb4] sm:$0xf]  ;;  %v632_v0 = vor.u32 %v758_v57, %v631_v56  ;;  %v633_v1 = vld [vmem:[#allocation2 + $0xb8] sm:$0xf0]  ;;  %v559_v2 = vld [vmem:[#allocation2 + $0x20] sm:$0xf]  ;;  %v572_v6 = vor.u32 %v741_v60, %v569_v61 }
  0x16   :  { %337 = vmatpush.bf16.msrb.mxu1 %v652_v47  ;;  %v740_v3 = vld [vmem:[#allocation2 + $0x24] sm:$0xf0]  ;;  %v623_v4 = vld [vmem:[#allocation2 + $0xa0] sm:$0xf]  ;;  %v636_v7 = vor.u32 %v757_v62, %v633_v1  ;;  %v739_v8 = vld [vmem:[#allocation2 + $0x24] sm:$0xf] }
  0x17   :  { %299 = vmatpush.bf16.msra.mxu2 %v576_v50  ;;  %v756_v5 = vld [vmem:[#allocation2 + $0xa4] sm:$0xf0]  ;;  %v561_v9 = vld [vmem:[#allocation2 + $0x28] sm:$0xf0]  ;;  %v560_v10 = vor.u32 %v740_v3, %v559_v2  ;;  %v755_v12 = vld [vmem:[#allocation2 + $0xa4] sm:$0xf] }
  0x18   :  { %312 = vmatpush.bf16.msra.mxu3 %v640_v51  ;;  %v624_v11 = vor.u32 %v756_v5, %v623_v4  ;;  %v625_v13 = vld [vmem:[#allocation2 + $0xa8] sm:$0xf0]  ;;  %v564_v14 = vor.u32 %v739_v8, %v561_v9  ;;  %v551_v16 = vld [vmem:[#allocation2 + $0x10] sm:$0xf]  ;;  %v738_v17 = vld [vmem:[#allocation2 + $0x14] sm:$0xf0] }
  0x19   :  { %325 = vmatpush.bf16.msrb.mxu0 %v580_v58  ;;  %v628_v15 = vor.u32 %v755_v12, %v625_v13  ;;  %v615_v18 = vld [vmem:[#allocation2 + $0x90] sm:$0xf]  ;;  %v552_v19 = vor.u32 %v738_v17, %v551_v16  ;;  %v754_v20 = vld [vmem:[#allocation2 + $0x94] sm:$0xf0]  ;;  %v737_v21 = vld [vmem:[#allocation2 + $0x14] sm:$0xf] }
  0x1a   :  { %338 = vmatpush.bf16.msrb.mxu1 %v644_v59  ;;  %v553_v22 = vld [vmem:[#allocation2 + $0x18] sm:$0xf0]  ;;  %v616_v23 = vor.u32 %v754_v20, %v615_v18  ;;  %v753_v25 = vld [vmem:[#allocation2 + $0x94] sm:$0xf]  ;;  %v543_v28 = vld [vmem:[#allocation2] sm:$0xf] }
  0x1b   :  { %300 = vmatpush.bf16.msra.mxu2 %v568_v63  ;;  %v556_v24 = vor.u32 %v737_v21, %v553_v22  ;;  %v617_v26 = vld [vmem:[#allocation2 + $0x98] sm:$0xf0]  ;;  %v736_v29 = vld [vmem:[#allocation2 + $0x4] sm:$0xf0]  ;;  %v607_v30 = vld [vmem:[#allocation2 + $0x80] sm:$0xf] }
  0x1c   :  { %313 = vmatpush.bf16.msra.mxu3 %v632_v0  ;;  %v620_v27 = vor.u32 %v753_v25, %v617_v26  ;;  %v544_v31 = vor.u32 %v736_v29, %v543_v28  ;;  %v752_v32 = vld [vmem:[#allocation2 + $0x84] sm:$0xf0]  ;;  %v735_v33 = vld [vmem:[#allocation2 + $0x4] sm:$0xf]  ;;  %v545_v34 = vld [vmem:[#allocation2 + $0x8] sm:$0xf0] }
  0x1d   :  { %326 = vmatpush.bf16.msrb.mxu0 %v572_v6  ;;  %v608_v35 = vor.u32 %v752_v32, %v607_v30  ;;  %v548_v36 = vor.u32 %v735_v33, %v545_v34  ;;  %v751_v37 = vld [vmem:[#allocation2 + $0x84] sm:$0xf]  ;;  %v609_v38 = vld [vmem:[#allocation2 + $0x88] sm:$0xf0]  ;;  %v782_v40 = vld [vmem:[%s971_s5 + $0x78] sm:$0xff]  ;;  %s521_s28 = sshll.u32 %s973_s7, 4  ;;  %s522_s28 = int_to_ptr.hbm [resolvable:$true] %s521_s28 }
  0x1e   :  { %339 = vmatpush.bf16.msrb.mxu1 %v636_v7  ;;  %v612_v39 = vor.u32 %v751_v37, %v609_v38  ;;  %v774_v41 = vld [vmem:[%s971_s5 + $0x38] sm:$0xff]  ;;  %v781_v42 = vld [vmem:[%s971_s5 + $0x70] sm:$0xff]  ;;  %v780_v44 = vld [vmem:[%s971_s5 + $0x68] sm:$0xff]  ;;  %vm512_vm1 = vcmask 56320  }
  0x1f   :  { %301 = vmatpush.bf16.msra.mxu2 %v560_v10  ;;  %v773_v43 = vld [vmem:[%s971_s5 + $0x30] sm:$0xff]  ;;  %v772_v45 = vld [vmem:[%s971_s5 + $0x28] sm:$0xff]  ;;  %v779_v46 = vld [vmem:[%s971_s5 + $0x60] sm:$0xff] }
  0x20   :  { %314 = vmatpush.bf16.msra.mxu3 %v624_v11  ;;  %v771_v47 = vld [vmem:[%s971_s5 + $0x20] sm:$0xff]  ;;  %v778_v48 = vld [vmem:[%s971_s5 + $0x58] sm:$0xff]  ;;  %v777_v50 = vld [vmem:[%s971_s5 + $0x50] sm:$0xff] }
  0x21   :  { %327 = vmatpush.bf16.msrb.mxu0 %v564_v14  ;;  %v48_v49 = vld [vmem:[%s968_s2] sm:$0x3]  ;;  %v770_v63 = vld [vmem:[%s971_s5 + $0x18] sm:$0xff]  ;;  %v776_v0 = vld [vmem:[%s971_s5 + $0x48] sm:$0xff] }
  0x22   :  { %340 = vmatpush.bf16.msrb.mxu1 %v628_v15  ;;  %v50_v51 = vperm.slane %v48_v49, 0  ;;  %v51_v52 = vperm.slane %v48_v49, 1  ;;  %v769_v1 = vld [vmem:[%s971_s5 + $0x10] sm:$0xff]  ;;  %v775_v2 = vld [vmem:[%s971_s5 + $0x40] sm:$0xff]  ;;  %v768_v3 = vld [vmem:[%s971_s5 + $0x8] sm:$0xff] }
  0x23   :  { %302 = vmatpush.bf16.msra.mxu2 %v552_v19  ;;  %v767_v4 = vld [vmem:[%s971_s5] sm:$0xff] }
  0x24   :  { %315 = vmatpush.bf16.msra.mxu3 %v616_v23  ;;  %v130_v5 = vld [vmem:[%s970_s4] sm:$0x3] }
  0x25   :  { %328 = vmatpush.bf16.msrb.mxu0 %v556_v24  ;;  %v133_v6 = vperm.slane %v130_v5, 1  ;;  %v132_v11 = vperm.slane %v130_v5, 0  ;;  %v787_v25 = vld [vmem:[%s972_s6] ss:$0 sm:$0xff] }
  0x26   :  { %341 = vmatpush.bf16.msrb.mxu1 %v620_v27 }
  0x27   :  { %303 = vmatpush.bf16.msra.mxu2 %v544_v31 }
  0x28   :  { %316 = vmatpush.bf16.msra.mxu3 %v608_v35 }
  0x29   :  { %329 = vmatpush.bf16.msrb.mxu0 %v548_v36 }
  0x2a   :  { %342 = vmatpush.bf16.msrb.mxu1 %v612_v39 }
  0x2b   :  { %484 = vmatpush.bf16.msrb.mxu2 %v774_v41 }
  0x2c   :  { %497 = vmatpush.bf16.msrb.mxu3 %v782_v40 }
  0x2f   :  { %485 = vmatpush.bf16.msrb.mxu2 %v773_v43 }
  0x30   :  { %498 = vmatpush.bf16.msrb.mxu3 %v781_v42 }
  0x33   :  { %486 = vmatpush.bf16.msrb.mxu2 %v772_v45 }
  0x34   :  { %499 = vmatpush.bf16.msrb.mxu3 %v780_v44 }
  0x37   :  { %487 = vmatpush.bf16.msrb.mxu2 %v771_v47 }
  0x38   :  { %500 = vmatpush.bf16.msrb.mxu3 %v779_v46 }
  0x3b   :  { %488 = vmatpush.bf16.msrb.mxu2 %v770_v63 }
  0x3c   :  { %501 = vmatpush.bf16.msrb.mxu3 %v778_v48 }
  0x3f   :  { %489 = vmatpush.bf16.msrb.mxu2 %v769_v1 }
  0x40   :  { %502 = vmatpush.bf16.msrb.mxu3 %v777_v50 }
  0x43   :  { %490 = vmatpush.bf16.msrb.mxu2 %v768_v3 }
  0x44   :  { %503 = vmatpush.bf16.msrb.mxu3 %v776_v0 }
  0x47   :  { %491 = vmatpush.bf16.msrb.mxu2 %v767_v4 }
  0x48   :  { %504 = vmatpush.bf16.msrb.mxu3 %v775_v2 }
  0x89   :  { %v77_v53 = vpop.f32.mrf.mxu0 }
  0x8a   :  { %v78_v54 = vadd.f32 %v77_v53, %v50_v51  ;;  %v90_v55 = vpop.f32.mrf.mxu1 }
  0x8b   :  { %v91_v56 = vadd.f32 %v90_v55, %v51_v52 }
  0x8c   :  { %v94_v57 = vmax.f32 %v78_v54, 0.0 }
  0x8d   :  { %v95_v58 = vmax.f32 %v91_v56, 0.0 }
  0x8e   :  { %v96_v59 = vpack.c.bf16 %v94_v57, %v94_v57 }
  0x8f   :  { %v97_v60 = vpack.c.bf16 %v95_v58, %v95_v58 }
  0x90   :  { %304 = vmatmul.bf16.vlgmr.msra.gmra.mxu2 %v96_v59  ;;  %330 = vmatmul.bf16.vlgmr.msrb.gmra.mxu0 %v96_v59 }
  0x91   :  { %317 = vmatmul.bf16.vlgmr.msra.gmra.mxu3 %v97_v60  ;;  %343 = vmatmul.bf16.vlgmr.msrb.gmra.mxu1 %v97_v60  ;;  %v79_v61 = vpop.f32.mrf.mxu0 }
  0x92   :  { %v92_v62 = vpop.f32.mrf.mxu1 }
 0x10d   :  { %v331_v7 = vpop.f32.mrf.mxu0 }
 0x10e   :  { %v332_v8 = vadd.f32 %v331_v7, %v133_v6  ;;  %v344_v9 = vpop.f32.mrf.mxu1 }
 0x110   :  { %v345_v10 = vadd.f32 %v344_v9, %v332_v8 }
 0x112   :  { %v349_v12 = vmax.f32 %v345_v10, 0.0 }
 0x113   :  { %v305_v13 = vpop.f32.mrf.mxu2 }
 0x114   :  { %v351_v14 = vpack.c.bf16 %v349_v12, %v349_v12  ;;  %v306_v15 = vadd.f32 %v305_v13, %v132_v11  ;;  %v318_v16 = vpop.f32.mrf.mxu3 }
 0x115   :  { %v333_v17 = vpop.f32.mrf.mxu0 }
 0x116   :  { %v319_v18 = vadd.f32 %v318_v16, %v306_v15  ;;  %v346_v19 = vpop.f32.mrf.mxu1  ;;  %505 = vmatmul.bf16.vlgmr.msrb.gmra.mxu3 %v351_v14 }
 0x118   :  { %v348_v20 = vmax.f32 %v319_v18, 0.0 }
 0x11a   :  { %v350_v21 = vpack.c.bf16 %v348_v20, %v348_v20 }
 0x11b   :  { %v307_v22 = vpop.f32.mrf.mxu2 }
 0x11c   :  { %v320_v23 = vpop.f32.mrf.mxu3  ;;  %492 = vmatmul.bf16.vlgmr.msrb.gmra.mxu2 %v350_v21 }
 0x199   :  { %v506_v24 = vpop.f32.mrf.mxu3 }
 0x19f   :  { %v493_v26 = vpop.f32.mrf.mxu2 }
 0x1a0   :  { %v494_v27 = vadd.f32 %v787_v25, %v493_v26 }
 0x1a1   :  { %v508_v28 = vpop.f32.mrf.mxu3 }
 0x1a2   :  { %v507_v29 = vadd.f32 %v506_v24, %v494_v27 }
 0x1a4   :  { %788 = vtanh.f32 %v507_v29 }
 0x1a7   :  { %v495_v30 = vpop.f32.mrf.mxu2 }
 0x1aa   :  { %v789_v31 = vpop.eup %788 }
 0x1ab   :  { %v511_v32 = vmul.f32 2.0, %v789_v31 }
 0x1ad   :  { %513 = vst.msk [vmem:[#allocation5] sm:$0xff] %vm512_vm1, %v511_v32 }
 0x1ae   :  { %524 = dma.vmem_to_hbm [thread:$0]  %s520_s25, 128, %s522_s28, [#allocation4]  }
 0x1af   :  { %840 = dma.done.wait [#allocation4], 128  }
 0x1b0   :  { %841 = vsyncadd [#allocation4], 4294967168 }
 0x1b1   :  { %529 = vsyncpa [#allocation3], 1 }
 0x1b2   :  { %530 = vsyncpa [#allocation4], 1 }

</bundles_post_ra>
